<compile_context>
chip_gen: v7x
topology: tpu7x:2x2x1
jax: 0.10.0
libtpu: 0.0.40
codegen_flags: <defaults>
</compile_context>

<pallas_src>
import jax
import jax.numpy as jnp
from jax.experimental import pallas as pl
from jax.experimental.pallas import tpu as pltpu


def _round_up(x, m):
    return ((x + m - 1) // m) * m


def _patch_embed_kernel(p_ref, w_ref, b_ref, o_ref):
    # p_ref: (TM, K)  bf16 patch tile (streamed over M)
    # w_ref: (K, Ep)  bf16 projection weight (single-buffered, VMEM-resident)
    # b_ref: (1, Ep)  f32 bias
    # o_ref: (TM, Ep) output tile
    acc = jnp.dot(p_ref[...], w_ref[...], preferred_element_type=jnp.float32)
    o_ref[...] = (acc + b_ref[...]).astype(o_ref.dtype)


def patch_embedding(x_nchw, weight, bias, patch_size, *, tm=1024, out_dtype=None):
    """x_nchw: (B, C, H, W); weight: (E, C, P, P); bias: (E,). Returns (B, Np, E)."""
    B, C, H, W = x_nchw.shape
    E = weight.shape[0]
    P = patch_size
    assert H % P == 0 and W % P == 0
    Hp, Wp = H // P, W // P
    Np = Hp * Wp
    K = C * P * P
    M = B * Np

    if out_dtype is None:
        out_dtype = x_nchw.dtype

    # --- Glue: cast to bf16 FIRST so the patchify relayout copy moves half the
    # bytes; XLA fuses convert+transpose+reshape into a single copy pass.
    x_bf16 = x_nchw.astype(jnp.bfloat16)
    w_bf16 = weight.astype(jnp.bfloat16)

    # (B, C, Hp, P, Wp, P) -> (B, Hp, Wp, C, P, P) -> (B*Np, C*P*P)
    # Flattening order (c, p, q) matches conv weight.reshape(E, C*P*P).
    patches = x_bf16.reshape(B, C, Hp, P, Wp, P)
    patches = patches.transpose(0, 2, 4, 1, 3, 5).reshape(M, K)

    # Conv weight (E, C, P, P) -> (K, E) so the kernel does patches @ w.
    w_flat = w_bf16.reshape(E, K).T

    # --- Lane-pad E only (weight/bias are tiny, fetched once).  K stays at
    # its true extent (full-extent last/second-last block dims are legal and
    # avoid zero-column MXU work + an extra HBM round trip of the patches).
    Ep = _round_up(E, 128)
    if Ep != E:
        w_flat = jnp.pad(w_flat, ((0, 0), (0, Ep - E)))
        bias = jnp.pad(bias, (0, Ep - E))
    b_row = bias.astype(jnp.float32).reshape(1, Ep)

    # --- Adaptive row-tile: big tiles for HBM roofline, but at least 2 grid
    # steps for small M so both v7x TensorCores get work and the double
    # buffer can actually overlap DMA with compute.
    TM = min(tm, _round_up(M, 8))
    if pl.cdiv(M, TM) < 2 and M > 8:
        TM = max(8, _round_up(pl.cdiv(M, 2), 8))
    grid = (pl.cdiv(M, TM),)  # partial tail block is masked by Pallas

    # --- VMEM budget: 2x patch tile (double-buffered) + 1x weight + 2x bias
    # + 2x output tile, with 2x headroom (>= 32 MiB so we never go below the
    # v6e/v7x scoped default; covers v5e's 16 MiB default explicitly).
    out_bytes = jnp.dtype(out_dtype).itemsize
    working_set = (2 * TM * K * 2) + (K * Ep * 2) + (2 * Ep * 4) + (2 * TM * Ep * out_bytes)
    vmem_limit = int(min(100 * 2**20, max(32 * 2**20, 2 * working_set)))

    out = pl.pallas_call(
        _patch_embed_kernel,
        out_shape=jax.ShapeDtypeStruct((M, Ep), out_dtype),
        grid=grid,
        in_specs=[
            # Streaming patch tiles over M (default depth-2 pipelining).
            pl.BlockSpec((TM, K), lambda i: (i, 0)),
            # Weight & bias: constant block index + single buffer -> DMA'd
            # once, stay VMEM-resident for the whole M loop.
            pl.BlockSpec((K, Ep), lambda i: (0, 0), pipeline_mode=pl.Buffered(1)),
            pl.BlockSpec((1, Ep), lambda i: (0, 0), pipeline_mode=pl.Buffered(1)),
        ],
        out_specs=pl.BlockSpec((TM, Ep), lambda i: (i, 0)),
        compiler_params=pltpu.CompilerParams(
            dimension_semantics=("parallel",),
            vmem_limit_bytes=vmem_limit,
        ),
    )(patches, w_flat, b_row)

    # Drop padded embedding columns (if any) and restore (B, Np, E).
    out = out[:, :E]
    return out.reshape(B, Np, E)


if __name__ == "__main__":
    # Small shapes consistent with the module (real C=3, P=16; scaled-down
    # image and embed dim).  K = 3*16*16 = 768 (lane-aligned, as in ViT).
    batch = 2
    num_channels = 3
    patch_size = 16
    embed_dim = 256
    img_size = 64  # -> (64/16)^2 = 16 patches per image, M = 32 rows

    key = jax.random.PRNGKey(0)
    k_x, k_w, k_b = jax.random.split(key, 3)

    x = jax.random.normal(
        k_x, (batch, num_channels, img_size, img_size), dtype=jnp.float32)
    # Deterministic parameter init (conv weight layout: (out, in, kh, kw)).
    fan_in = num_channels * patch_size * patch_size
    weight = jax.random.normal(
        k_w, (embed_dim, num_channels, patch_size, patch_size),
        dtype=jnp.float32) * (1.0 / fan_in ** 0.5)
    bias = jax.random.normal(k_b, (embed_dim,), dtype=jnp.float32) * 0.01

    out = patch_embedding(x, weight, bias, patch_size)
    out = jax.block_until_ready(out)

    # Reference (plain JAX, f32) of the same math.
    B, C, H, W = x.shape
    P = patch_size
    Hp, Wp = H // P, W // P
    ref_patches = x.reshape(B, C, Hp, P, Wp, P).transpose(0, 2, 4, 1, 3, 5)
    ref_patches = ref_patches.reshape(B * Hp * Wp, C * P * P)
    ref = ref_patches @ weight.reshape(embed_dim, -1).T + bias
    ref = ref.reshape(B, Hp * Wp, embed_dim)

    assert out.shape == (batch, (img_size // patch_size) ** 2, embed_dim)
    # bf16 MXU inputs with f32 accumulation -> loosened tolerance vs f32 ref.
    assert jnp.allclose(out, ref, atol=3e-2, rtol=3e-2)
    print("KERNEL_OK")
</pallas_src>

<mosaic_0001>
module attributes {stable_mosaic.version = 11 : i64} {
  func.func @_patch_embed_kernel(%arg0: i32, %arg1: memref<16x768xbf16, #tpu.memory_space<vmem>>, %arg2: memref<768x256xbf16, #tpu.memory_space<vmem>>, %arg3: memref<1x256xf32, #tpu.memory_space<vmem>>, %arg4: memref<16x256xf32, #tpu.memory_space<vmem>>) attributes {dimension_semantics = [#tpu.dimension_semantics<parallel>], iteration_bounds = array<i64: 2>, scalar_prefetch = 0 : i64, scratch_operands = 0 : i64, tpu.core_type = #tpu.core_type<tc>, window_params = [{transform_indices = @transform_0, window_bounds = array<i64: 16, 768>}, {pipeline_mode = #tpu.pipeline_mode<synchronous>, transform_indices = @transform_1, window_bounds = array<i64: 768, 256>}, {pipeline_mode = #tpu.pipeline_mode<synchronous>, transform_indices = @transform_2, window_bounds = array<i64: 1, 256>}, {transform_indices = @transform_3, window_bounds = array<i64: 16, 256>}]} {
    %c0 = arith.constant 0 : index
    %c0_0 = arith.constant 0 : index
    %0 = vector.load %arg1[%c0, %c0_0] : memref<16x768xbf16, #tpu.memory_space<vmem>>, vector<16x768xbf16>
    %c0_1 = arith.constant 0 : index
    %c0_2 = arith.constant 0 : index
    %1 = vector.load %arg2[%c0_1, %c0_2] : memref<768x256xbf16, #tpu.memory_space<vmem>>, vector<768x256xbf16>
    %cst = arith.constant dense<0.000000e+00> : vector<16x256xf32>
    %2 = tpu.matmul %0, %1, %cst {dimension_numbers = #tpu.dot_dimension_numbers<[1], [0], [0], [1], [0, 0, 1, 1], [], []>} : vector<16x768xbf16>, vector<768x256xbf16>, vector<16x256xf32> -> vector<16x256xf32>
    %c0_3 = arith.constant 0 : index
    %c0_4 = arith.constant 0 : index
    %3 = vector.load %arg3[%c0_3, %c0_4] : memref<1x256xf32, #tpu.memory_space<vmem>>, vector<1x256xf32>
    %4 = vector.broadcast %3 : vector<1x256xf32> to vector<16x256xf32>
    %5 = arith.addf %2, %4 : vector<16x256xf32>
    %c0_5 = arith.constant 0 : index
    %c0_6 = arith.constant 0 : index
    %6 = vector.load %arg4[%c0_5, %c0_6] : memref<16x256xf32, #tpu.memory_space<vmem>>, vector<16x256xf32>
    tpu.vector_store %arg4[%c0_5, %c0_6], %5 {strides = array<i32>} : memref<16x256xf32, #tpu.memory_space<vmem>>, vector<16x256xf32>,
    return
  }
  func.func @transform_0(%arg0: i32) -> (i32, i32) {
    %c0_i32 = arith.constant 0 : i32
    %c0_i32_0 = arith.constant 0 : i32
    return %arg0, %c0_i32 : i32, i32
  }
  func.func @transform_1(%arg0: i32) -> (i32, i32) {
    %c0_i32 = arith.constant 0 : i32
    %c0_i32_0 = arith.constant 0 : i32
    %c0_i32_1 = arith.constant 0 : i32
    return %c0_i32, %c0_i32_0 : i32, i32
  }
  func.func @transform_2(%arg0: i32) -> (i32, i32) {
    %c0_i32 = arith.constant 0 : i32
    %c0_i32_0 = arith.constant 0 : i32
    %c0_i32_1 = arith.constant 0 : i32
    return %c0_i32, %c0_i32_0 : i32, i32
  }
  func.func @transform_3(%arg0: i32) -> (i32, i32) {
    %c0_i32 = arith.constant 0 : i32
    %c0_i32_0 = arith.constant 0 : i32
    return %arg0, %c0_i32 : i32, i32
  }
}

</mosaic_0001>

<bundles_post_ra>
// kernel: tpu_custom_call.1
= control target key start
LH: loop header
LB: loop body
LE: loop exit
PB: predicated region body
PF: predicated region fallthrough
CT: control target
= control target key end

     0   :  { %8 = vsyncpa [#allocation3], 0  ;;  %s1785_s0 = inlined_call_operand.hbm [shape: bf16[32,768], index: 0, kind: input, shape index: {}]   ;;  %s1786_s1 = inlined_call_operand.hbm [shape: bf16[768,256], index: 1, kind: input, shape index: {}]   ;;  %s1787_s2 = inlined_call_operand.vmem [shape: f32[1,256], index: 2, kind: input, shape index: {}]   ;;  %s1788_s3 = inlined_call_operand.hbm [shape: f32[32,256], index: 3, kind: output, shape index: {}]  }
   0x1   :  { %10 = vsyncpa [#allocation3 + $0x1], 0 }
   0x2   :  { %11 = vsyncpa [#allocation6], 0 }
   0x3   :  { %12 = vsyncpa [#allocation4], 0 }
   0x4   :  { %14 = vsyncpa [#allocation4 + $0x1], 0  ;;  %s1572_s12 = smov 0   ;;  %s1574_s13 = smov 0  }
   0x5   :  { %s1576_s14 = smov 0   ;;  %s1578_s15 = smov 0  }
   0x6 LB: > { %s1593_s16 = sadd.s32 4294967295, %s1541_s15   ;;  %s1062_s17 = sadd.s32 4294967294, %s1541_s15   ;;  %s1541_s15 = sphi %s1578_s15, %s1808_s15   ;;  %s1537_s14 = sphi %s1576_s14, %s1807_s14   ;;  %s1533_s13 = sphi %s1574_s13, %s1806_s13   ;;  %s1529_s12 = sphi %s1572_s12, %s1805_s12  }
   0x7   : > { %p40_p0 = scmp.ne.s32.totalorder %s1533_s13, %s1529_s12  ;;  %p1789_p1 = scmp.eq.s32.totalorder %s1593_s16, 0 }
   0x8   : > { %p112_p3 = scmp.eq.s32.totalorder %s1062_s17, 1  ;;  %p1063_p5 = scmp.ge.s32.totalorder %s1541_s15, 1 }
   0x9   : > { %p1602_p4 = por %p1789_p1, %p40_p0  ;;  %p119_p7 = scmp.lt.s32.totalorder %s1541_s15, 3 }
   0xa   : > { %p1607_p6 = por %p112_p3, %p40_p0  ;;  %s1543_s21 = smov [#allocation5]  }
   0xb   : > { %s1792_s18 = scalar_select %p1602_p4, 1, 0 }
   0xc   : > { %s1793_s19 = scalar_select %p1607_p6, 1, 0 }
   0xd   : > { %p1612_p8 = pnand %p1063_p5, %p119_p7  ;;  %s131_s22 = sshll.u32 %s1543_s21, 4  ;;  %s1616_s22 = int_to_ptr.vmem [resolvable:$true] %s131_s22 }
   0xe   : > { %s1628_s24 = sadd.s32 1, %s1541_s15   ;;  %s27_s25 = sadd.s32 1, %s1537_s14 }
   0xf   : > { %s1794_s20 = scalar_select %p1612_p8, 1, 0 }
  0x10   : > { %p1205_p9 = pneg %p1612_p8  ;;  %s24_s26 = ssub.s32 %s1541_s15, %s1628_s24 }
  0x11   : > { %s1413_s29 = scalar_lea.hbm %s1786_s1, 12288 }
  0x12   : > { %p1623_p11 = pnand %p1205_p9, %p1789_p1  ;;  %p1414_p12 = scmp.ne.s32.totalorder %s1786_s1, %s1413_s29 }
  0x13   : > { %p1420_p5 = scmp.lt.u32.totalorder %s1413_s29, %s1786_s1 }
  0x14   : > { %p1415_p13 = pneg %p1623_p11 }
  0x16   : > { %p1416_p0 = pnand %p1415_p13, %p1414_p12 }
  0x18   : > { %p1417_p3 = pneg %p1416_p0 }
  0x1a   : > { %p1422_p7 = pnand %p1420_p5, %p1417_p3 }
  0x1c   : > { %1425 = shalt.err (!%p1422_p7)
}
  0x1d   : > { %s1426_s7 = scalar_lea.vmem %s1616_s22, 12288  ;;  %p1434_p2 = scmp.lt.s32.totalorder %s1616_s22, %s1616_s22 }
  0x1e   : > { %p1427_p9 = scmp.ne.s32.totalorder %s1616_s22, %s1426_s7  ;;  %p1435_p6 = scmp.lt.s32.totalorder %s1426_s7, %s1426_s7 }
  0x20   : > { %p1429_p10 = pnand %p1427_p9, %p1415_p13  ;;  %p1436_p4 = por %p1435_p6, %p1434_p2 }
  0x22   : > { %p1430_p1 = pneg %p1429_p10 }
  0x24   : > { %p1437_p8 = pnand %p1436_p4, %p1430_p1 }
  0x26   : > { %1440 = shalt.err (!%p1437_p8)
}
  0x27   : > { %s1544_s8 = smov 128   ;;  %s1545_s9 = smov 8  }
  0x28   : > { %1208 = dma.hbm_to_vmem [thread:$0]  (!%p1623_p11), %s1786_s1, 12288, %s1616_s22, [#allocation6], %s1544_s8, %s1544_s8, %s1545_s9  }
  0x29   : > { %p25_p2 = scmp.eq.s32.totalorder %s24_s26, 0  ;;  %p34_p1 = scmp.ne.s32.totalorder %s1537_s14, %s1533_s13 }
  0x2a   : > { %p35_p4 = scmp.eq.s32.totalorder %s1541_s15, 0  ;;  %p1218_p6 = scmp.lt.s32.totalorder %s1541_s15, 2 }
  0x2b   : > { %s1659_s17 = scalar_select %p25_p2, %s1537_s14, %s27_s25  }
  0x2c   : > { %p36_p8 = por %p35_p4, %p34_p1  ;;  %p1796_p10 = scmp.eq.s32.totalorder %s1593_s16, 1 }
  0x2d   : > { %s148_s27 = sand.u32 1, %s1537_s14   ;;  %s1195_s28 = smul.u32 768, %s1541_s15 }
  0x2e   : > { %p1663_p12 = por %p1796_p10, %p34_p1  ;;  %s1194_s29 = smul.u32 48, %s148_s27 }
  0x2f   : > { %s1672_s4 = scalar_lea.hbm %s1785_s0, %s1195_s28  ;;  %p1674_p11 = pnand %p1218_p6, %p36_p8 }
  0x30   : > { %s152_s25 = scalar_lea.vmem [#allocation2], %s1194_s29  ;;  %s1680_s5 = scalar_lea.sflag [#allocation3], %s148_s27 }
  0x31   : > { %s160_s26 = sshll.u32 %s152_s25, 4  ;;  %s1441_s6 = scalar_lea.hbm %s1672_s4, 768  ;;  %s1678_s26 = int_to_ptr.vmem [resolvable:$true] %s160_s26 }
  0x32   : > { %p1442_p13 = scmp.ne.s32.totalorder %s1672_s4, %s1441_s6  ;;  %p1443_p0 = pneg %p1674_p11 }
  0x33   : > { %s1446_s9 = scalar_lea.hbm %s1785_s0, 1536  ;;  %p1447_p7 = scmp.lt.u32.totalorder %s1672_s4, %s1785_s0 }
  0x34   : > { %p1444_p3 = pnand %p1443_p0, %p1442_p13  ;;  %p1448_p9 = scmp.lt.u32.totalorder %s1446_s9, %s1441_s6 }
  0x35   : > { %p1450_p1 = scmp.lt.u32.totalorder %s1441_s6, %s1672_s4 }
  0x36   : > { %p1445_p5 = pneg %p1444_p3  ;;  %p1449_p2 = por %p1448_p9, %p1447_p7 }
  0x38   : > { %p1451_p4 = por %p1450_p1, %p1449_p2 }
  0x3a   : > { %p1452_p6 = pnand %p1451_p4, %p1445_p5 }
  0x3c   : > { %1455 = shalt.err (!%p1452_p6)
}
  0x3d   : > { %s1456_s27 = scalar_lea.vmem %s1678_s26, 768  ;;  %s1546_s28 = smov [#allocation2]  }
  0x3e   : > { %p1457_p8 = scmp.ne.s32.totalorder %s1678_s26, %s1456_s27  ;;  %s1461_s29 = sshll.u32 %s1546_s28, 4  ;;  %s1462_s29 = int_to_ptr.vmem [resolvable:$false] %s1461_s29 }
  0x3f   : > { %s1463_s23 = scalar_lea.vmem %s1462_s29, 1536  ;;  %p1464_p3 = scmp.lt.s32.totalorder %s1678_s26, %s1462_s29 }
  0x40   : > { %p1459_p10 = pnand %p1457_p8, %p1443_p0  ;;  %p1465_p7 = scmp.lt.s32.totalorder %s1463_s23, %s1456_s27 }
  0x42   : > { %p1460_p13 = pneg %p1459_p10  ;;  %p1466_p9 = por %p1465_p7, %p1464_p3 }
  0x44   : > { %p1467_p2 = pnand %p1466_p9, %p1460_p13 }
  0x46   : > { %1470 = shalt.err (!%p1467_p2)
}
  0x47   : > { %s1547_s30 = smov 384   ;;  %s1548_s25 = smov 24  }
  0x48   : > { %1212 = dma.hbm_to_vmem [thread:$0]  (!%p1674_p11), %s1672_s4, 768, %s1678_s26, %s1680_s5, %s1547_s30, %s1547_s30, %s1548_s25  }
  0x49   : > { %p1799_p0 = scmp.ne.s32.totalorder %s1794_s20, 0 }
  0x4a   : > { %s1711_s6 = sand.u32 (!%p1799_p0), 1, %s1533_s13   ;;  %p1800_p5 = scmp.ne.s32.totalorder (!%p1799_p0), %s1792_s18, 0 }
  0x4b   : > { %172 = sbr.rel (%p1799_p0) target bundleno = 447 (0x1bf), region = 32  ;;  %s175_s8 = scalar_lea.sflag (!%p1799_p0), [#allocation3], %s1711_s6 }
  0x4c   : > { %s1196_s7 = smul.u32 (!%p1799_p0), 48, %s1711_s6 }
  0x4e   : > { %s1715_s9 = scalar_lea.vmem (!%p1799_p0), [#allocation2], %s1196_s7 }
  0x52   : > { %1516 = dma.done.wait (%p1800_p5), %s175_s8, 768  }
  0x53   : > { %1518 = vsyncadd (%p1800_p5), %s175_s8, 4294966528  ;;  %p1801_p11 = scmp.eq.s32.totalorder %s1593_s16, 0 }
  0x55   : > { %1520 = dma.done.wait (%p1801_p11), [#allocation6], 12288   ;;  %p1802_p1 = pmov %p1801_p11 }
  0x56   : > { %v1260_v0 = vld [vmem:[#allocation5 + $0x104] ss:$8 sps:$4 sm:$0xff]   ;;  %v1262_v1 = vld [vmem:[#allocation5 + $0x100] ss:$8 sps:$4 sm:$0xff]   ;;  %v1263_v2 = vld [vmem:[#allocation5 + $0x114] ss:$8 sps:$4 sm:$0xff]  }
  0x57   : > { %1522 = vsyncadd (%p1802_p1), [#allocation6], 4294955008  ;;  %874 = vmatprep.subr.bf16.mxu0 %v1260_v0  ;;  %v1265_v3 = vld [vmem:[#allocation5 + $0x110] ss:$8 sps:$4 sm:$0xff]   ;;  %v1266_v4 = vld [vmem:[#allocation5 + $0x124] ss:$8 sps:$4 sm:$0xff]  }
  0x58   : > { %875 = vmatpush1.bf16.msra.mxu0 %v1262_v1  ;;  %v1268_v5 = vld [vmem:[#allocation5 + $0x120] ss:$8 sps:$4 sm:$0xff]   ;;  %v1269_v6 = vld [vmem:[#allocation5 + $0x134] ss:$8 sps:$4 sm:$0xff]   ;;  %v1271_v7 = vld [vmem:[#allocation5 + $0x130] ss:$8 sps:$4 sm:$0xff]  }
  0x59   : > { %876 = vmatprep.subr.bf16.mxu0 %v1263_v2  ;;  %v1272_v8 = vld [vmem:[#allocation5 + $0x144] ss:$8 sps:$4 sm:$0xff]   ;;  %v1274_v9 = vld [vmem:[#allocation5 + $0x140] ss:$8 sps:$4 sm:$0xff]   ;;  %v1275_v10 = vld [vmem:[#allocation5 + $0x154] ss:$8 sps:$4 sm:$0xff]  }
  0x5a   : > { %v1277_v11 = vld [vmem:[#allocation5 + $0x150] ss:$8 sps:$4 sm:$0xff]   ;;  %v1278_v12 = vld [vmem:[#allocation5 + $0x164] ss:$8 sps:$4 sm:$0xff]   ;;  %v1307_v14 = vld [vmem:[#allocation5] ss:$8 sps:$4 sm:$0xff]  }
  0x5b   : > { %v1305_v13 = vld [vmem:[#allocation5 + $0x4] ss:$8 sps:$4 sm:$0xff]   ;;  %v1280_v15 = vld [vmem:[#allocation5 + $0x160] ss:$8 sps:$4 sm:$0xff]   ;;  %v1311_v16 = vld [vmem:[#allocation5 + $0x14] ss:$8 sps:$4 sm:$0xff]  }
  0x5c   : > { %877 = vmatpush1.bf16.msra.mxu0 %v1265_v3  ;;  %831 = vmatprep.subr.bf16.mxu1 %v1305_v13  ;;  %v1313_v17 = vld [vmem:[#allocation5 + $0x10] ss:$8 sps:$4 sm:$0xff]   ;;  %v1281_v18 = vld [vmem:[#allocation5 + $0x174] ss:$8 sps:$4 sm:$0xff]   ;;  %v1320_v21 = vld [vmem:[#allocation5 + $0x24] ss:$8 sps:$4 sm:$0xff]  }
  0x5d   : > { %878 = vmatprep.subr.bf16.mxu0 %v1266_v4  ;;  %832 = vmatpush1.bf16.msra.mxu1 %v1307_v14  ;;  %v1316_v19 = vld [vmem:[%s1715_s9 + $0xc] ss:$24 sps:$4 sm:$0xff]   ;;  %v1283_v20 = vld [vmem:[#allocation5 + $0x170] ss:$8 sps:$4 sm:$0xff]   ;;  %v1322_v22 = vld [vmem:[#allocation5 + $0x20] ss:$8 sps:$4 sm:$0xff]  }
  0x5e   : > { %833 = vmatprep.subr.bf16.mxu1 %v1311_v16  ;;  %v1284_v23 = vld [vmem:[#allocation5 + $0x184] ss:$8 sps:$4 sm:$0xff]   ;;  %906 = vmatprep.mubr.bf16.mxu0 %v1316_v19  ;;  %v1286_v24 = vld [vmem:[#allocation5 + $0x180] ss:$8 sps:$4 sm:$0xff]   ;;  %v1326_v25 = vld [vmem:[#allocation5 + $0x34] ss:$8 sps:$4 sm:$0xff]  }
  0x5f   : > { %v1287_v26 = vld [vmem:[#allocation5 + $0x194] ss:$8 sps:$4 sm:$0xff]   ;;  %v1328_v27 = vld [vmem:[#allocation5 + $0x30] ss:$8 sps:$4 sm:$0xff]   ;;  %v1332_v28 = vld [vmem:[#allocation5 + $0x44] ss:$8 sps:$4 sm:$0xff]  }
  0x60   : > { %879 = vmatpush1.bf16.msra.mxu0 %v1268_v5  ;;  %v1289_v29 = vld [vmem:[#allocation5 + $0x190] ss:$8 sps:$4 sm:$0xff]   ;;  %v1290_v30 = vld [vmem:[#allocation5 + $0x1a4] ss:$8 sps:$4 sm:$0xff]   ;;  %v1334_v31 = vld [vmem:[#allocation5 + $0x40] ss:$8 sps:$4 sm:$0xff]  }
  0x61   : > { %880 = vmatprep.subr.bf16.mxu0 %v1269_v6  ;;  %834 = vmatpush1.bf16.msra.mxu1 %v1313_v17  ;;  %v1338_v32 = vld [vmem:[#allocation5 + $0x54] ss:$8 sps:$4 sm:$0xff]   ;;  %v1292_v33 = vld [vmem:[#allocation5 + $0x1a0] ss:$8 sps:$4 sm:$0xff]   ;;  %v1340_v35 = vld [vmem:[#allocation5 + $0x50] ss:$8 sps:$4 sm:$0xff]  }
  0x62   : > { %835 = vmatprep.subr.bf16.mxu1 %v1320_v21  ;;  %v1293_v34 = vld [vmem:[#allocation5 + $0x1b4] ss:$8 sps:$4 sm:$0xff]   ;;  %v1344_v36 = vld [vmem:[#allocation5 + $0x64] ss:$8 sps:$4 sm:$0xff]   ;;  %v1295_v37 = vld [vmem:[#allocation5 + $0x1b0] ss:$8 sps:$4 sm:$0xff]  }
  0x63   : > { %v1296_v38 = vld [vmem:[#allocation5 + $0x1c4] ss:$8 sps:$4 sm:$0xff]   ;;  %v1346_v39 = vld [vmem:[#allocation5 + $0x60] ss:$8 sps:$4 sm:$0xff]   ;;  %v1350_v40 = vld [vmem:[#allocation5 + $0x74] ss:$8 sps:$4 sm:$0xff]  }
  0x64   : > { %881 = vmatpush1.bf16.msra.mxu0 %v1271_v7  ;;  %v1298_v41 = vld [vmem:[#allocation5 + $0x1c0] ss:$8 sps:$4 sm:$0xff]   ;;  %v1299_v42 = vld [vmem:[#allocation5 + $0x1d4] ss:$8 sps:$4 sm:$0xff]   ;;  %v1352_v43 = vld [vmem:[#allocation5 + $0x70] ss:$8 sps:$4 sm:$0xff]  }
  0x65   : > { %882 = vmatprep.subr.bf16.mxu0 %v1272_v8  ;;  %836 = vmatpush1.bf16.msra.mxu1 %v1322_v22  ;;  %v1356_v44 = vld [vmem:[#allocation5 + $0x84] ss:$8 sps:$4 sm:$0xff]   ;;  %v1301_v45 = vld [vmem:[#allocation5 + $0x1d0] ss:$8 sps:$4 sm:$0xff]   ;;  %v1358_v47 = vld [vmem:[#allocation5 + $0x80] ss:$8 sps:$4 sm:$0xff]  }
  0x66   : > { %837 = vmatprep.subr.bf16.mxu1 %v1326_v25  ;;  %v1302_v46 = vld [vmem:[#allocation5 + $0x1e4] ss:$8 sps:$4 sm:$0xff]   ;;  %v1362_v48 = vld [vmem:[#allocation5 + $0x94] ss:$8 sps:$4 sm:$0xff]   ;;  %v1304_v49 = vld [vmem:[#allocation5 + $0x1e0] ss:$8 sps:$4 sm:$0xff]  }
  0x67   : > { %v1308_v50 = vld [vmem:[#allocation5 + $0x1f4] ss:$8 sps:$4 sm:$0xff]   ;;  %v1364_v51 = vld [vmem:[#allocation5 + $0x90] ss:$8 sps:$4 sm:$0xff]   ;;  %v1368_v52 = vld [vmem:[#allocation5 + $0xa4] ss:$8 sps:$4 sm:$0xff]  }
  0x68   : > { %883 = vmatpush1.bf16.msra.mxu0 %v1274_v9  ;;  %v1310_v53 = vld [vmem:[#allocation5 + $0x1f0] ss:$8 sps:$4 sm:$0xff]   ;;  %v1319_v54 = vld [vmem:[#allocation5 + $0x204] ss:$8 sps:$4 sm:$0xff]   ;;  %v1370_v55 = vld [vmem:[#allocation5 + $0xa0] ss:$8 sps:$4 sm:$0xff]  }
  0x69   : > { %884 = vmatprep.subr.bf16.mxu0 %v1275_v10  ;;  %838 = vmatpush1.bf16.msra.mxu1 %v1328_v27  ;;  %v1374_v56 = vld [vmem:[#allocation5 + $0xb4] ss:$8 sps:$4 sm:$0xff]   ;;  %v1314_v57 = vld [vmem:[%s1715_s9 + $0x8] ss:$24 sps:$4 sm:$0xff]   ;;  %v1380_v61 = vld [vmem:[#allocation5 + $0xc4] ss:$8 sps:$4 sm:$0xff]  }
  0x6a   : > { %839 = vmatprep.subr.bf16.mxu1 %v1332_v28  ;;  %v1317_v58 = vld [vmem:[#allocation5 + $0x200] ss:$8 sps:$4 sm:$0xff]   ;;  %v1325_v59 = vld [vmem:[#allocation5 + $0x214] ss:$8 sps:$4 sm:$0xff]   ;;  %v1376_v60 = vld [vmem:[#allocation5 + $0xb0] ss:$8 sps:$4 sm:$0xff]  }
  0x6b   : > { %v1406_v62 = vld [vmem:[%s1715_s9 + $0x4] ss:$24 sps:$4 sm:$0xff]   ;;  %v1323_v63 = vld [vmem:[#allocation5 + $0x210] ss:$8 sps:$4 sm:$0xff]   ;;  %v1382_v0 = vld [vmem:[#allocation5 + $0xc0] ss:$8 sps:$4 sm:$0xff]  }
  0x6c   : > { %885 = vmatpush1.bf16.msra.mxu0 %v1277_v11  ;;  %v1412_v1 = vld [vmem:[%s1715_s9 + $0x14] ss:$24 sps:$4 sm:$0xff]   ;;  %863 = vmatprep.mubr.bf16.mxu1 %v1406_v62  ;;  %v1329_v4 = vld [vmem:[#allocation5 + $0x220] ss:$8 sps:$4 sm:$0xff]   ;;  %v1388_v5 = vld [vmem:[#allocation5 + $0xd0] ss:$8 sps:$4 sm:$0xff]  }
  0x6d   : > { %886 = vmatprep.subr.bf16.mxu0 %v1278_v12  ;;  %840 = vmatpush1.bf16.msra.mxu1 %v1334_v31  ;;  %v1331_v2 = vld [vmem:[#allocation5 + $0x224] ss:$8 sps:$4 sm:$0xff]   ;;  %v1386_v3 = vld [vmem:[#allocation5 + $0xd4] ss:$8 sps:$4 sm:$0xff]   ;;  %v1335_v8 = vld [vmem:[#allocation5 + $0x230] ss:$8 sps:$4 sm:$0xff]  }
  0x6e   : > { %841 = vmatprep.subr.bf16.mxu1 %v1338_v32  ;;  %v1337_v6 = vld [vmem:[#allocation5 + $0x234] ss:$8 sps:$4 sm:$0xff]   ;;  %v1392_v7 = vld [vmem:[#allocation5 + $0xe4] ss:$8 sps:$4 sm:$0xff]   ;;  %v1394_v9 = vld [vmem:[#allocation5 + $0xe0] ss:$8 sps:$4 sm:$0xff]  }
  0x6f   : > { %v1343_v10 = vld [vmem:[#allocation5 + $0x244] ss:$8 sps:$4 sm:$0xff]   ;;  %v1398_v11 = vld [vmem:[#allocation5 + $0xf4] ss:$8 sps:$4 sm:$0xff]   ;;  %v1341_v12 = vld [vmem:[#allocation5 + $0x240] ss:$8 sps:$4 sm:$0xff]  }
  0x70   : > { %887 = vmatpush1.bf16.msra.mxu0 %v1280_v15  ;;  %v1400_v13 = vld [vmem:[#allocation5 + $0xf0] ss:$8 sps:$4 sm:$0xff]   ;;  %v1349_v14 = vld [vmem:[#allocation5 + $0x254] ss:$8 sps:$4 sm:$0xff]   ;;  %v1355_v17 = vld [vmem:[#allocation5 + $0x264] ss:$8 sps:$4 sm:$0xff]  }
  0x71   : > { %888 = vmatprep.subr.bf16.mxu0 %v1281_v18  ;;  %842 = vmatpush1.bf16.msra.mxu1 %v1340_v35  ;;  %v1404_v15 = vld [vmem:[%s1715_s9] ss:$24 sps:$4 sm:$0xff]   ;;  %v1361_v19 = vld [vmem:[#allocation5 + $0x274] ss:$8 sps:$4 sm:$0xff]   ;;  %v1367_v21 = vld [vmem:[#allocation5 + $0x284] ss:$8 sps:$4 sm:$0xff]  }
  0x72   : > { %843 = vmatprep.subr.bf16.mxu1 %v1344_v36  ;;  %v1347_v16 = vld [vmem:[#allocation5 + $0x250] ss:$8 sps:$4 sm:$0xff]   ;;  %v1353_v18 = vld [vmem:[#allocation5 + $0x260] ss:$8 sps:$4 sm:$0xff]   ;;  %v1379_v25 = vld [vmem:[#allocation5 + $0x2a4] ss:$8 sps:$4 sm:$0xff]  }
  0x73   : > { %v1365_v22 = vld [vmem:[#allocation5 + $0x280] ss:$8 sps:$4 sm:$0xff]   ;;  %v1385_v27 = vld [vmem:[#allocation5 + $0x2b4] ss:$8 sps:$4 sm:$0xff]   ;;  %v1383_v28 = vld [vmem:[#allocation5 + $0x2b0] ss:$8 sps:$4 sm:$0xff]  }
  0x74   : > { %889 = vmatpush1.bf16.msra.mxu0 %v1283_v20  ;;  %v1359_v20 = vld [vmem:[#allocation5 + $0x270] ss:$8 sps:$4 sm:$0xff]   ;;  %v1397_v31 = vld [vmem:[#allocation5 + $0x2d4] ss:$8 sps:$4 sm:$0xff]   ;;  %s1071_s4 = sshll.u32 %s1711_s6, 5  ;;  %s1181_s5 = sshll.u32 %s1593_s16, 9 }
  0x75   : > { %890 = vmatprep.subr.bf16.mxu0 %v1284_v23  ;;  %844 = vmatpush1.bf16.msra.mxu1 %v1346_v39  ;;  %v1373_v23 = vld [vmem:[#allocation5 + $0x294] ss:$8 sps:$4 sm:$0xff]   ;;  %v1395_v32 = vld [vmem:[#allocation5 + $0x2d0] ss:$8 sps:$4 sm:$0xff]   ;;  %s204_s22 = scalar_lea.vmem [#allocation7], %s1071_s4  ;;  %s1741_s16 = scalar_lea.hbm %s1788_s3, %s1181_s5 }
  0x76   : > { %845 = vmatprep.subr.bf16.mxu1 %v1350_v40  ;;  %v1409_v35 = vld [vmem:[#allocation5 + $0x2f4] ss:$8 sps:$4 sm:$0xff]   ;;  %v1407_v36 = vld [vmem:[#allocation5 + $0x2f0] ss:$8 sps:$4 sm:$0xff]   ;;  %s979_s26 = sshll.u32 %s204_s22, 4  ;;  %s965_s27 = scalar_lea.sflag [#allocation4], %s1711_s6  ;;  %s1736_s26 = int_to_ptr.vmem [resolvable:$true] %s979_s26 }
  0x77   : > { %s1471_s28 = scalar_lea.vmem %s1736_s26, 512  ;;  %s1549_s29 = smov [#allocation7]  }
  0x78   : > { %891 = vmatpush1.bf16.msra.mxu0 %v1286_v24  ;;  %v1371_v24 = vld [vmem:[#allocation5 + $0x290] ss:$8 sps:$4 sm:$0xff]   ;;  %p1472_p4 = scmp.ne.s32.totalorder %s1736_s26, %s1471_s28  ;;  %s1475_s23 = sshll.u32 %s1549_s29, 4  ;;  %s1476_s23 = int_to_ptr.vmem [resolvable:$false] %s1475_s23 }
  0x79   : > { %892 = vmatprep.subr.bf16.mxu0 %v1287_v26  ;;  %846 = vmatpush1.bf16.msra.mxu1 %v1352_v43  ;;  %v1377_v26 = vld [vmem:[#allocation5 + $0x2a0] ss:$8 sps:$4 sm:$0xff]   ;;  %s1477_s30 = scalar_lea.vmem %s1476_s23, 1024  ;;  %p1478_p10 = scmp.lt.s32.totalorder %s1736_s26, %s1476_s23 }
  0x7a   : > { %847 = vmatprep.subr.bf16.mxu1 %v1356_v44  ;;  %p1473_p6 = pnand %p1472_p4, %p1663_p12  ;;  %p1479_p13 = scmp.lt.s32.totalorder %s1477_s30, %s1471_s28 }
  0x7c   : > { %893 = vmatpush1.bf16.msra.mxu0 %v1289_v29  ;;  %v1391_v29 = vld [vmem:[#allocation5 + $0x2c4] ss:$8 sps:$4 sm:$0xff]   ;;  %p1474_p8 = pneg %p1473_p6  ;;  %p1480_p3 = por %p1479_p13, %p1478_p10 }
  0x7d   : > { %894 = vmatprep.subr.bf16.mxu0 %v1290_v30  ;;  %848 = vmatpush1.bf16.msra.mxu1 %v1358_v47  ;;  %v1389_v30 = vld [vmem:[#allocation5 + $0x2c0] ss:$8 sps:$4 sm:$0xff]  }
  0x7e   : > { %849 = vmatprep.subr.bf16.mxu1 %v1362_v48  ;;  %p1481_p7 = pnand %p1480_p3, %p1474_p8 }
  0x80   : > { %895 = vmatpush1.bf16.msra.mxu0 %v1292_v33  ;;  %v1403_v33 = vld [vmem:[#allocation5 + $0x2e4] ss:$8 sps:$4 sm:$0xff]  }
  0x81   : > { %896 = vmatprep.subr.bf16.mxu0 %v1293_v34  ;;  %850 = vmatpush1.bf16.msra.mxu1 %v1364_v51  ;;  %v1401_v34 = vld [vmem:[#allocation5 + $0x2e0] ss:$8 sps:$4 sm:$0xff]  }
  0x82   : > { %851 = vmatprep.subr.bf16.mxu1 %v1368_v52 }
  0x84   : > { %897 = vmatpush1.bf16.msra.mxu0 %v1295_v37  ;;  %v1410_v37 = vld [vmem:[%s1715_s9 + $0x10] ss:$24 sps:$4 sm:$0xff]  }
  0x85   : > { %898 = vmatprep.subr.bf16.mxu0 %v1296_v38  ;;  %852 = vmatpush1.bf16.msra.mxu1 %v1370_v55 }
  0x86   : > { %853 = vmatprep.subr.bf16.mxu1 %v1374_v56 }
  0x88   : > { %899 = vmatpush1.bf16.msra.mxu0 %v1298_v41 }
  0x89   : > { %900 = vmatprep.subr.bf16.mxu0 %v1299_v42  ;;  %854 = vmatpush1.bf16.msra.mxu1 %v1376_v60  ;;  %v311_v42 = vlaneseq }
  0x8a   : > { %855 = vmatprep.subr.bf16.mxu1 %v1380_v61 }
  0x8b   : > { %v312_v43 = vshrl.u32 %v311_v42, 7 }
  0x8c   : > { %901 = vmatpush1.bf16.msra.mxu0 %v1301_v45  ;;  %v309_v45 = vld [vmem:[%s1787_s2] sm:$0x3] }
  0x8d   : > { %902 = vmatprep.subr.bf16.mxu0 %v1302_v46  ;;  %856 = vmatpush1.bf16.msra.mxu1 %v1382_v0  ;;  %v313_v44 = vsub.s32 0, %v312_v43  ;;  %v317_v46 = vsub.s32 1, %v312_v43 }
  0x8e   : > { %857 = vmatprep.subr.bf16.mxu1 %v1386_v3 }
  0x8f   : > { %v314_v47 = vrot.slane %v309_v45, %v313_v44  ;;  %v318_v48 = vrot.slane %v309_v45, %v317_v46 }
  0x90   : > { %903 = vmatpush1.bf16.msra.mxu0 %v1304_v49 }
  0x91   : > { %904 = vmatprep.subr.bf16.mxu0 %v1308_v50  ;;  %858 = vmatpush1.bf16.msra.mxu1 %v1388_v5 }
  0x92   : > { %859 = vmatprep.subr.bf16.mxu1 %v1392_v7 }
  0x94   : > { %905 = vmatpush1.bf16.msra.mxu0 %v1310_v53 }
  0x95   : > { %917 = vmatprep.subr.bf16.mxu0 %v1319_v54  ;;  %860 = vmatpush1.bf16.msra.mxu1 %v1394_v9 }
  0x96   : > { %861 = vmatprep.subr.bf16.mxu1 %v1398_v11 }
  0x97   : > { %907 = vmatmul.mubr.bf16.vlgmr.msra.gmra.mrb[0].mxu0 %v1314_v57 }
  0x98   : > { %918 = vmatpush1.bf16.msra.mxu0 %v1317_v58  ;;  %949 = vmatprep.mubr.bf16.mxu0 %v1412_v1 }
  0x99   : > { %919 = vmatprep.subr.bf16.mxu0 %v1325_v59  ;;  %862 = vmatpush1.bf16.msra.mxu1 %v1400_v13 }
  0x9c   : > { %920 = vmatpush1.bf16.msra.mxu0 %v1323_v63  ;;  %864 = vmatmul.mubr.bf16.vlgmr.msra.gmra.mrb[0].mxu1 %v1404_v15 }
  0x9d   : > { %921 = vmatprep.subr.bf16.mxu0 %v1331_v2 }
  0xa0   : > { %922 = vmatpush1.bf16.msra.mxu0 %v1329_v4 }
  0xa1   : > { %923 = vmatprep.subr.bf16.mxu0 %v1337_v6 }
  0xa4   : > { %924 = vmatpush1.bf16.msra.mxu0 %v1335_v8 }
  0xa5   : > { %925 = vmatprep.subr.bf16.mxu0 %v1343_v10 }
  0xa8   : > { %926 = vmatpush1.bf16.msra.mxu0 %v1341_v12 }
  0xa9   : > { %927 = vmatprep.subr.bf16.mxu0 %v1349_v14 }
  0xac   : > { %928 = vmatpush1.bf16.msra.mxu0 %v1347_v16 }
  0xad   : > { %929 = vmatprep.subr.bf16.mxu0 %v1355_v17 }
  0xb0   : > { %930 = vmatpush1.bf16.msra.mxu0 %v1353_v18 }
  0xb1   : > { %931 = vmatprep.subr.bf16.mxu0 %v1361_v19 }
  0xb4   : > { %932 = vmatpush1.bf16.msra.mxu0 %v1359_v20 }
  0xb5   : > { %933 = vmatprep.subr.bf16.mxu0 %v1367_v21 }
  0xb8   : > { %934 = vmatpush1.bf16.msra.mxu0 %v1365_v22 }
  0xb9   : > { %935 = vmatprep.subr.bf16.mxu0 %v1373_v23 }
  0xbc   : > { %936 = vmatpush1.bf16.msra.mxu0 %v1371_v24 }
  0xbd   : > { %937 = vmatprep.subr.bf16.mxu0 %v1379_v25 }
  0xc0   : > { %938 = vmatpush1.bf16.msra.mxu0 %v1377_v26 }
  0xc1   : > { %939 = vmatprep.subr.bf16.mxu0 %v1385_v27 }
  0xc4   : > { %940 = vmatpush1.bf16.msra.mxu0 %v1383_v28 }
  0xc5   : > { %941 = vmatprep.subr.bf16.mxu0 %v1391_v29 }
  0xc8   : > { %942 = vmatpush1.bf16.msra.mxu0 %v1389_v30 }
  0xc9   : > { %943 = vmatprep.subr.bf16.mxu0 %v1397_v31 }
  0xcc   : > { %944 = vmatpush1.bf16.msra.mxu0 %v1395_v32 }
  0xcd   : > { %945 = vmatprep.subr.bf16.mxu0 %v1403_v33 }
  0xd0   : > { %946 = vmatpush1.bf16.msra.mxu0 %v1401_v34 }
  0xd1   : > { %947 = vmatprep.subr.bf16.mxu0 %v1409_v35 }
  0xd4   : > { %948 = vmatpush1.bf16.msra.mxu0 %v1407_v36 }
  0xd7   : > { %950 = vmatmul.mubr.bf16.vlgmr.msra.gmra.mrb[0].mxu0 %v1410_v37 }
 0x16f   : > { %v865_v38 = vpop.f32.mrb[0].mxu1 }
 0x170   : > { %v867_v39 = vpop.f32.mrb[1].mxu1  ;;  %v866_v49 = vadd.f32 %v865_v38, %v314_v47 }
 0x171   : > { %v869_v40 = vpop.f32.mrb[2].mxu1  ;;  %v868_v50 = vadd.f32 %v867_v39, %v318_v48 }
 0x172   : > { %v871_v41 = vpop.f32.mrb[3].mxu1  ;;  %v870_v52 = vadd.f32 %v869_v40, %v314_v47 }
 0x173   : > { %v872_v55 = vadd.f32 %v871_v41, %v318_v48 }
 0x1aa   : > { %v951_v51 = vpop.f32.mrb[0].mxu0 }
 0x1ab   : > { %v1183_v53 = vadd.f32 %v951_v51, %v866_v49  ;;  %v953_v54 = vpop.f32.mrb[1].mxu0 }
 0x1ac   : > { %v1185_v56 = vadd.f32 %v953_v54, %v868_v50  ;;  %v955_v57 = vpop.f32.mrb[2].mxu0 }
 0x1ad   : > { %960 = vst [vmem:[%s204_s22] sm:$0xff] %v1183_v53  ;;  %v1187_v58 = vadd.f32 %v955_v57, %v870_v52  ;;  %v957_v59 = vpop.f32.mrb[3].mxu0 }
 0x1ae   : > { %961 = vst [vmem:[%s204_s22 + $0x8] sm:$0xff] %v1185_v56  ;;  %v1189_v60 = vadd.f32 %v957_v59, %v872_v55 }
 0x1af   : > { %962 = vst [vmem:[%s204_s22 + $0x10] sm:$0xff] %v1187_v58 }
 0x1b0   : > { %963 = vst [vmem:[%s204_s22 + $0x18] sm:$0xff] %v1189_v60 }
 0x1b1   : > { %1484 = shalt.err (!%p1481_p7)
}
 0x1b2   : > { %s1485_s25 = scalar_lea.hbm %s1741_s16, 512  ;;  %s1489_s9 = scalar_lea.hbm %s1788_s3, 1024 }
 0x1b3   : > { %p1486_p9 = scmp.ne.s32.totalorder %s1741_s16, %s1485_s25  ;;  %p1490_p5 = scmp.lt.u32.totalorder %s1741_s16, %s1788_s3 }
 0x1b4   : > { %p1491_p11 = scmp.lt.u32.totalorder %s1489_s9, %s1485_s25  ;;  %p1493_p4 = scmp.lt.u32.totalorder %s1485_s25, %s1741_s16 }
 0x1b5   : > { %p1487_p2 = pnand %p1486_p9, %p1663_p12 }
 0x1b6   : > { %p1492_p1 = por %p1491_p11, %p1490_p5 }
 0x1b7   : > { %p1488_p0 = pneg %p1487_p2 }
 0x1b8   : > { %p1494_p6 = por %p1493_p4, %p1492_p1 }
 0x1ba   : > { %p1495_p8 = pnand %p1494_p6, %p1488_p0 }
 0x1bc   : > { %1498 = shalt.err (!%p1495_p8)
}
 0x1bd   : > { %s1550_s4 = smov 256   ;;  %s1551_s22 = smov 16  }
 0x1be   : > { %1203 = dma.vmem_to_hbm [thread:$0]  (%p1663_p12), %s1736_s26, 512, %s1741_s16, %s965_s27, %s1550_s4, %s1550_s4, %s1551_s22  }
 0x1bf PF: > { %s994_s5 = sand.u32 1, %s1529_s12   ;;  %p1803_p10 = scmp.ne.s32.totalorder %s1793_s19, 0 }
 0x1c0   : > { %p1804_p13 = scmp.ge.s32.totalorder %s1541_s15, 2  ;;  %s995_s10 = scalar_lea.sflag [#allocation4], %s994_s5 }
 0x1c2   : > { %p1214_p3 = pnand %p1804_p13, %p1803_p10 }
 0x1c4   : > { %1524 = dma.done.wait (!%p1214_p3), %s995_s10, 512  }
 0x1c5   : > { %1526 = vsyncadd (!%p1214_p3), %s995_s10, 4294966784  ;;  %p17_p7 = scmp.ge.s32.totalorder %s1628_s24, 4   ;;  %s1805_s12 = smov %s1533_s13 }
 0x1c6   : > { %s1806_s13 = smov %s1537_s14  ;;  %s1807_s14 = smov %s1659_s17 }
 0x1c7   : > { %s1808_s15 = smov %s1628_s24  ;;  %19 = sbr.rel (!%p17_p7) target bundleno = 6 (0x6), region = 81 }
 0x1ce   :  { %1000 = vsyncpa [#allocation3], 1 }
 0x1cf   :  { %1002 = vsyncpa [#allocation3 + $0x1], 1 }
 0x1d0   :  { %1003 = vsyncpa [#allocation6], 1 }
 0x1d1   :  { %1004 = vsyncpa [#allocation4], 1 }
 0x1d2   :  { %1006 = vsyncpa [#allocation4 + $0x1], 1 }

</bundles_post_ra>
